<compile_context>
chip_gen: v5e
topology: v5e:2x2
jax: 0.10.0
libtpu: 0.0.40
codegen_flags: <defaults>
</compile_context>

<pallas_src>
import jax
import jax.numpy as jnp
import numpy as np
from jax import lax
from jax.experimental import pallas as pl
from jax.experimental.pallas import tpu as pltpu

OUT_DIM = 64
MAX_POS = 5120


def _round_up(x, m):
    return ((x + m - 1) // m) * m


# ----------------------------- Pallas kernel ---------------------------------
def fused_gather_kernel(idx_ref, table_ref, o_ref):
    """Gather rows of the (Linear-folded) table into the output block.

    idx_ref:   (n_pad,) int32 in SMEM (scalar-prefetched, already clamped to [0, MAX_POS])
    table_ref: (R_pad, OUT_DIM) f32, VMEM-resident (constant index_map -> copied once)
    o_ref:     (tile_rows, OUT_DIM) f32 output block
    """
    tile_rows = o_ref.shape[0]
    base = pl.program_id(0) * tile_rows

    def body(r, carry):
        i = idx_ref[base + r]
        # TODO(synk): replace the per-row dynamic slice with a vectorized sublane gather
        # (jnp.take on the resident table) once Mosaic lowers large-table row gathers;
        # the dynamic-slice loop is the portable mechanism today.
        o_ref[pl.ds(r, 1), :] = table_ref[pl.ds(i, 1), :]
        return carry

    lax.fori_loop(0, tile_rows, body, 0, unroll=8)


# ------------------------------ parameters -----------------------------------
def make_params(key):
    k_w, k_b = jax.random.split(key, 2)

    # fixed sinusoidal position table (max_pos + 1, out_dim): odd cols sin, even cols cos
    positions = jnp.arange(0, MAX_POS + 1, dtype=jnp.float32)
    inv_freq = 1.0 / (10000.0 ** (jnp.arange(0.0, OUT_DIM, 2.0) / OUT_DIM))
    sinusoid = jnp.outer(positions, inv_freq)                    # (MAX_POS+1, OUT_DIM//2)
    pos_table = jnp.zeros((MAX_POS + 1, OUT_DIM), jnp.float32)
    pos_table = pos_table.at[:, 1::2].set(jnp.sin(sinusoid))
    pos_table = pos_table.at[:, 0::2].set(jnp.cos(sinusoid))

    # nn.Linear(out_dim, out_dim): U(-1/sqrt(in), 1/sqrt(in))
    bound = 1.0 / np.sqrt(OUT_DIM)
    w = jax.random.uniform(k_w, (OUT_DIM, OUT_DIM), jnp.float32, -bound, bound)
    b = jax.random.uniform(k_b, (OUT_DIM,), jnp.float32, -bound, bound)

    # Fold the Linear into the table once per weight update; pad rows to a sublane multiple
    # so the resident VMEM block satisfies the (8, 128)/full-dim tiling rule.
    fused = pos_table @ w.T + b                                  # (MAX_POS+1, OUT_DIM)
    r_pad = _round_up(fused.shape[0], 8)
    fused = jnp.pad(fused, ((0, r_pad - fused.shape[0]), (0, 0)))

    return dict(pos_table=pos_table, w=w, b=b, fused_table=fused)


# ------------------------------- wrapper --------------------------------------
def position_embedding_forward(positions, params, *, tile_rows=4096):
    """positions: int (B, L) -> float32 (B, L, OUT_DIM)."""
    B, L = positions.shape
    N = B * L
    pos = positions.reshape(N).astype(jnp.int32)

    # Faithful port of `positions.where(positions > max_pos, max_pos)`.
    # TODO(synk): this maps every in-range id to row max_pos (the whole forward collapses
    # to one constant row); almost certainly a ported bug (intended clamp is
    # where(pos > max_pos, max_pos, pos)) — kept as-is to preserve module semantics.
    idx = jnp.where(pos > MAX_POS, pos, MAX_POS)
    # torch would raise IndexError for idx > max_pos; clamp explicitly instead.
    idx = jnp.clip(idx, 0, MAX_POS)

    # Row tile: big (amortize ~0.35us/step), but capped so the grid has >= 2 parallel
    # steps whenever N allows (v7x has two TensorCores).
    tn = min(tile_rows, _round_up(pl.cdiv(N, 2), 8))
    n_tiles = pl.cdiv(N, tn)
    n_pad = n_tiles * tn
    if n_pad != N:
        # Pad only the 4-byte/row index vector — never the (N, 64) activations.
        idx = jnp.pad(idx, (0, n_pad - N), constant_values=MAX_POS)
    # TODO(synk): idx is scalar-prefetched into SMEM; for N beyond a few hundred K rows
    # switch to per-tile index delivery to stay inside the scalar-memory budget.

    table = params["fused_table"]                                # (R_pad, OUT_DIM)
    bytes_accessed = int(idx.size * 4 + table.size * 4 + N * OUT_DIM * 4)

    out = pl.pallas_call(
        fused_gather_kernel,
        out_shape=jax.ShapeDtypeStruct((N, OUT_DIM), jnp.float32),
        grid_spec=pltpu.PrefetchScalarGridSpec(
            num_scalar_prefetch=1,
            grid=(n_tiles,),
            in_specs=[
                # Fused table resident in VMEM: constant block index -> copied once.
                pl.BlockSpec((table.shape[0], OUT_DIM), lambda i, idx_ref: (0, 0)),
            ],
            out_specs=pl.BlockSpec((tn, OUT_DIM), lambda i, idx_ref: (i, 0)),
        ),
        compiler_params=pltpu.CompilerParams(dimension_semantics=("parallel",)),
        cost_estimate=pl.CostEstimate(
            flops=0, transcendentals=0, bytes_accessed=bytes_accessed),
    )(idx, table)

    return out.reshape(B, L, OUT_DIM)


# ----------------------------- pure-JAX reference ------------------------------
def position_embedding_ref(positions, params):
    idx = jnp.where(positions > MAX_POS, positions, MAX_POS)
    idx = jnp.clip(idx, 0, MAX_POS)
    embeds = params["pos_table"][idx]                            # (B, L, OUT_DIM)
    return embeds @ params["w"].T + params["b"]


# --------------------------------- main ----------------------------------------
if __name__ == "__main__":
    key = jax.random.PRNGKey(0)
    k_params, k_pos = jax.random.split(key, 2)

    params = make_params(k_params)

    B, L = 2, 8
    positions = jax.random.randint(k_pos, (B, L), 0, 200, dtype=jnp.int32)

    out = jax.block_until_ready(position_embedding_forward(positions, params))

    ref = position_embedding_ref(positions, params)
    np.testing.assert_allclose(np.asarray(out), np.asarray(ref), rtol=1e-5, atol=1e-5)

    print("KERNEL_OK")
</pallas_src>

<mosaic_0001>
module attributes {stable_mosaic.version = 11 : i64} {
  func.func @fused_gather_kernel(%arg0: i32, %arg1: memref<16xi32, #tpu.memory_space<smem>>, %arg2: memref<5128x64xf32, #tpu.memory_space<vmem>>, %arg3: memref<8x64xf32, #tpu.memory_space<vmem>>) attributes {dimension_semantics = [#tpu.dimension_semantics<parallel>], iteration_bounds = array<i64: 2>, scalar_prefetch = 1 : i64, scratch_operands = 0 : i64, tpu.core_type = #tpu.core_type<tc>, window_params = [{pipeline_mode = #tpu.pipeline_mode<synchronous>, transform_indices = @transform_0, window_bounds = array<i64: 5128, 64>}, {transform_indices = @transform_1, window_bounds = array<i64: 8, 64>}]} {
    %c8_i32 = arith.constant 8 : i32
    %0 = arith.muli %arg0, %c8_i32 : i32
    %c0_i32 = arith.constant 0 : i32
    %1 = arith.addi %0, %c0_i32 : i32
    %2 = arith.index_cast %1 : i32 to index
    %3 = memref.load %arg1[%2] : memref<16xi32, #tpu.memory_space<smem>>
    %4 = arith.index_cast %3 : i32 to index
    %c0 = arith.constant 0 : index
    %5 = vector.load %arg2[%4, %c0] : memref<5128x64xf32, #tpu.memory_space<vmem>>, vector<1x64xf32>
    %6 = arith.index_cast %c0_i32 : i32 to index
    %c0_0 = arith.constant 0 : index
    %7 = vector.load %arg3[%6, %c0_0] : memref<8x64xf32, #tpu.memory_space<vmem>>, vector<1x64xf32>
    tpu.vector_store %arg3[%6, %c0_0], %5 {strides = array<i32>} : memref<8x64xf32, #tpu.memory_space<vmem>>, vector<1x64xf32>,
    %c1_i32 = arith.constant 1 : i32
    %8 = arith.addi %0, %c1_i32 : i32
    %9 = arith.index_cast %8 : i32 to index
    %10 = memref.load %arg1[%9] : memref<16xi32, #tpu.memory_space<smem>>
    %11 = arith.index_cast %10 : i32 to index
    %c0_1 = arith.constant 0 : index
    %12 = vector.load %arg2[%11, %c0_1] : memref<5128x64xf32, #tpu.memory_space<vmem>>, vector<1x64xf32>
    %13 = arith.index_cast %c1_i32 : i32 to index
    %c0_2 = arith.constant 0 : index
    %14 = vector.load %arg3[%13, %c0_2] : memref<8x64xf32, #tpu.memory_space<vmem>>, vector<1x64xf32>
    tpu.vector_store %arg3[%13, %c0_2], %12 {strides = array<i32>} : memref<8x64xf32, #tpu.memory_space<vmem>>, vector<1x64xf32>,
    %c2_i32 = arith.constant 2 : i32
    %15 = arith.addi %0, %c2_i32 : i32
    %16 = arith.index_cast %15 : i32 to index
    %17 = memref.load %arg1[%16] : memref<16xi32, #tpu.memory_space<smem>>
    %18 = arith.index_cast %17 : i32 to index
    %c0_3 = arith.constant 0 : index
    %19 = vector.load %arg2[%18, %c0_3] : memref<5128x64xf32, #tpu.memory_space<vmem>>, vector<1x64xf32>
    %20 = arith.index_cast %c2_i32 : i32 to index
    %c0_4 = arith.constant 0 : index
    %21 = vector.load %arg3[%20, %c0_4] : memref<8x64xf32, #tpu.memory_space<vmem>>, vector<1x64xf32>
    tpu.vector_store %arg3[%20, %c0_4], %19 {strides = array<i32>} : memref<8x64xf32, #tpu.memory_space<vmem>>, vector<1x64xf32>,
    %c3_i32 = arith.constant 3 : i32
    %22 = arith.addi %0, %c3_i32 : i32
    %23 = arith.index_cast %22 : i32 to index
    %24 = memref.load %arg1[%23] : memref<16xi32, #tpu.memory_space<smem>>
    %25 = arith.index_cast %24 : i32 to index
    %c0_5 = arith.constant 0 : index
    %26 = vector.load %arg2[%25, %c0_5] : memref<5128x64xf32, #tpu.memory_space<vmem>>, vector<1x64xf32>
    %27 = arith.index_cast %c3_i32 : i32 to index
    %c0_6 = arith.constant 0 : index
    %28 = vector.load %arg3[%27, %c0_6] : memref<8x64xf32, #tpu.memory_space<vmem>>, vector<1x64xf32>
    tpu.vector_store %arg3[%27, %c0_6], %26 {strides = array<i32>} : memref<8x64xf32, #tpu.memory_space<vmem>>, vector<1x64xf32>,
    %c4_i32 = arith.constant 4 : i32
    %29 = arith.addi %0, %c4_i32 : i32
    %30 = arith.index_cast %29 : i32 to index
    %31 = memref.load %arg1[%30] : memref<16xi32, #tpu.memory_space<smem>>
    %32 = arith.index_cast %31 : i32 to index
    %c0_7 = arith.constant 0 : index
    %33 = vector.load %arg2[%32, %c0_7] : memref<5128x64xf32, #tpu.memory_space<vmem>>, vector<1x64xf32>
    %34 = arith.index_cast %c4_i32 : i32 to index
    %c0_8 = arith.constant 0 : index
    %35 = vector.load %arg3[%34, %c0_8] : memref<8x64xf32, #tpu.memory_space<vmem>>, vector<1x64xf32>
    tpu.vector_store %arg3[%34, %c0_8], %33 {strides = array<i32>} : memref<8x64xf32, #tpu.memory_space<vmem>>, vector<1x64xf32>,
    %c5_i32 = arith.constant 5 : i32
    %36 = arith.addi %0, %c5_i32 : i32
    %37 = arith.index_cast %36 : i32 to index
    %38 = memref.load %arg1[%37] : memref<16xi32, #tpu.memory_space<smem>>
    %39 = arith.index_cast %38 : i32 to index
    %c0_9 = arith.constant 0 : index
    %40 = vector.load %arg2[%39, %c0_9] : memref<5128x64xf32, #tpu.memory_space<vmem>>, vector<1x64xf32>
    %41 = arith.index_cast %c5_i32 : i32 to index
    %c0_10 = arith.constant 0 : index
    %42 = vector.load %arg3[%41, %c0_10] : memref<8x64xf32, #tpu.memory_space<vmem>>, vector<1x64xf32>
    tpu.vector_store %arg3[%41, %c0_10], %40 {strides = array<i32>} : memref<8x64xf32, #tpu.memory_space<vmem>>, vector<1x64xf32>,
    %c6_i32 = arith.constant 6 : i32
    %43 = arith.addi %0, %c6_i32 : i32
    %44 = arith.index_cast %43 : i32 to index
    %45 = memref.load %arg1[%44] : memref<16xi32, #tpu.memory_space<smem>>
    %46 = arith.index_cast %45 : i32 to index
    %c0_11 = arith.constant 0 : index
    %47 = vector.load %arg2[%46, %c0_11] : memref<5128x64xf32, #tpu.memory_space<vmem>>, vector<1x64xf32>
    %48 = arith.index_cast %c6_i32 : i32 to index
    %c0_12 = arith.constant 0 : index
    %49 = vector.load %arg3[%48, %c0_12] : memref<8x64xf32, #tpu.memory_space<vmem>>, vector<1x64xf32>
    tpu.vector_store %arg3[%48, %c0_12], %47 {strides = array<i32>} : memref<8x64xf32, #tpu.memory_space<vmem>>, vector<1x64xf32>,
    %c7_i32 = arith.constant 7 : i32
    %50 = arith.addi %0, %c7_i32 : i32
    %51 = arith.index_cast %50 : i32 to index
    %52 = memref.load %arg1[%51] : memref<16xi32, #tpu.memory_space<smem>>
    %53 = arith.index_cast %52 : i32 to index
    %c0_13 = arith.constant 0 : index
    %54 = vector.load %arg2[%53, %c0_13] : memref<5128x64xf32, #tpu.memory_space<vmem>>, vector<1x64xf32>
    %55 = arith.index_cast %c7_i32 : i32 to index
    %c0_14 = arith.constant 0 : index
    %56 = vector.load %arg3[%55, %c0_14] : memref<8x64xf32, #tpu.memory_space<vmem>>, vector<1x64xf32>
    tpu.vector_store %arg3[%55, %c0_14], %54 {strides = array<i32>} : memref<8x64xf32, #tpu.memory_space<vmem>>, vector<1x64xf32>,
    %c8_i32_15 = arith.constant 8 : i32
    return
  }
  func.func @transform_0(%arg0: i32, %arg1: memref<16xi32, #tpu.memory_space<smem>>) -> (i32, i32) {
    %c0_i32 = arith.constant 0 : i32
    %c0_i32_0 = arith.constant 0 : i32
    %c0_i32_1 = arith.constant 0 : i32
    return %c0_i32, %c0_i32_0 : i32, i32
  }
  func.func @transform_1(%arg0: i32, %arg1: memref<16xi32, #tpu.memory_space<smem>>) -> (i32, i32) {
    %c0_i32 = arith.constant 0 : i32
    %c0_i32_0 = arith.constant 0 : i32
    return %arg0, %c0_i32 : i32, i32
  }
}

</mosaic_0001>

<bundles_post_ra>
// kernel: tpu_custom_call.1
= control target key start
LH: loop header
LB: loop body
LE: loop exit
PB: predicated region body
PF: predicated region fallthrough
CT: control target
= control target key end

     0   :  { %s343_s12 = smov [#allocation3]   ;;  %s496_s0 = inlined_call_operand.vmem [shape: s32[16], index: 0, kind: input, shape index: {}]   ;;  %s497_s1 = inlined_call_operand.vmem [shape: f32[5128,64], index: 1, kind: input, shape index: {}]   ;;  %s498_s2 = inlined_call_operand.hbm [shape: f32[16,64], index: 2, kind: output, shape index: {}]  }
   0x1   :  { %s8_s11 = sshll.u32 %s496_s0, 4  ;;  %s9_s11 = int_to_ptr.vmem [resolvable:$true] %s8_s11 }
   0x2   :  { %11 = dma.vmem_to_smem %s9_s11, 16, %s343_s12, [#allocation2] }
   0x3   :  { %321 = dma.done.wait [#allocation2], 16 }
   0x4   :  { %322 = vsyncadd [#allocation2], 4294967280 }
   0x5   :  { %14 = sfence }
   0x6   :  { %15 = vsyncpa [#allocation5], 0 }
   0x7   :  { %17 = vsyncpa [#allocation5 + $0x1], 0  ;;  %s362_s13 = smov 0   ;;  %s364_s14 = smov 0  }
   0x8   :  { %s366_s15 = smov 0   ;;  %s368_s16 = smov 0  }
   0x9 LB: > { %s215_s0 = sadd.s32 4294967295, %s341_s16   ;;  %s216_s17 = sadd.s32 4294967294, %s341_s16   ;;  %s341_s16 = sphi %s368_s16, %s506_s16   ;;  %s337_s15 = sphi %s366_s15, %s505_s15   ;;  %s333_s14 = sphi %s364_s14, %s504_s14   ;;  %s329_s13 = sphi %s362_s13, %s503_s13  }
   0xa   : > { %s385_s18 = sadd.s32 1, %s341_s16   ;;  %s51_s19 = sadd.s32 1, %s337_s15 }
   0xb   : > { %s48_s20 = ssub.s32 %s341_s16, %s385_s18  ;;  %p61_p0 = scmp.ne.s32.totalorder %s337_s15, %s333_s14 }
   0xc   : > { %p49_p1 = scmp.eq.s32.totalorder %s48_s20, 0  ;;  %p62_p2 = scmp.eq.s32.totalorder %s215_s0, 1 }
   0xd   : > { %p67_p3 = scmp.ne.s32.totalorder %s333_s14, %s329_s13  ;;  %p68_p4 = scmp.eq.s32.totalorder %s216_s17, 1 }
   0xe   : > { %s395_s21 = scalar_select %p49_p1, %s337_s15, %s51_s19  }
   0xf   : > { %p397_p5 = por %p62_p2, %p61_p0  ;;  %p401_p6 = por %p68_p4, %p67_p3 }
  0x10   : > { %p218_p7 = scmp.ge.s32.totalorder %s341_s16, 1  ;;  %p89_p8 = scmp.lt.s32.totalorder %s341_s16, 3 }
  0x12   : > { %p90_p9 = pnand %p218_p7, %p89_p8 }
  0x13   : > { %s499_s24 = sand.u32 (!%p90_p9), 1, %s333_s14   ;;  %s408_s25 = sshll.u32 (!%p90_p9), %s215_s0, 3 }
  0x14   : > { %93 = sbr.rel (%p90_p9) target bundleno = 47 (0x2f), region = 24  ;;  %s219_s26 = sshll.u32 (!%p90_p9), %s499_s24, 3 }
  0x15   : > { %s105_s27 = sld [smem:[#allocation3 + %s408_s25]] (!%p90_p9)  ;;  %s110_s28 = sadd.s32 (!%p90_p9), 1, %s408_s25 }
  0x16   : > { %s115_s29 = sadd.s32 (!%p90_p9), 2, %s408_s25  ;;  %s111_s30 = sld [smem:[#allocation3 + %s110_s28]] (!%p90_p9) }
  0x17   : > { %s120_s3 = sadd.s32 (!%p90_p9), 3, %s408_s25  ;;  %s116_s4 = sld [smem:[#allocation3 + %s115_s29]] (!%p90_p9) }
  0x18   : > { %s125_s5 = sadd.s32 (!%p90_p9), 4, %s408_s25  ;;  %s121_s6 = sld [smem:[#allocation3 + %s120_s3]] (!%p90_p9) }
  0x19   : > { %vm108_vm0 = vcmask 516096   ;;  %s130_s7 = sadd.s32 5, %s408_s25  ;;  %s126_s11 = sld [smem:[#allocation3 + %s125_s5]] }
  0x1a   : > { %s131_s12 = sld [smem:[#allocation3 + %s130_s7]]  ;;  %s135_s0 = sadd.s32 6, %s408_s25 }
  0x1b   : > { %s106_s10 = scalar_lea.vmem %s497_s1, %s105_s27  ;;  %s422_s17 = scalar_lea.vmem [#allocation4], %s219_s26 }
  0x1c   : > { %v107_v0 = vld [vmem:[%s106_s10] sm:$0x1]  ;;  %s136_s19 = sld [smem:[#allocation3 + %s135_s0]]  ;;  %s140_s20 = sadd.s32 7, %s408_s25 }
  0x1d   : > { %109 = vst.msk [vmem:[%s422_s17] sm:$0x1] %vm108_vm0, %v107_v0  ;;  %s112_s3 = scalar_lea.vmem %s497_s1, %s111_s30  ;;  %s141_s27 = sld [smem:[#allocation3 + %s140_s20]] }
  0x1e   : > { %v113_v1 = vld [vmem:[%s112_s3] sm:$0x1]  ;;  %s117_s26 = scalar_lea.vmem %s497_s1, %s116_s4  ;;  %s156_s10 = scalar_lea.hbm %s498_s2, %s408_s25 }
  0x1f   : > { %114 = vst.msk [vmem:[%s422_s17 + $0x1] sm:$0x1] %vm108_vm0, %v113_v1  ;;  %v118_v2 = vld [vmem:[%s117_s26] sm:$0x1]  ;;  %s122_s28 = scalar_lea.vmem %s497_s1, %s121_s6  ;;  %s158_s30 = sshll.u32 %s422_s17, 4  ;;  %s159_s30 = int_to_ptr.vmem [resolvable:$true] %s158_s30 }
  0x20   : > { %119 = vst.msk [vmem:[%s422_s17 + $0x2] sm:$0x1] %vm108_vm0, %v118_v2  ;;  %v123_v3 = vld [vmem:[%s122_s28] sm:$0x1]  ;;  %s127_s4 = scalar_lea.vmem %s497_s1, %s126_s11  ;;  %s132_s5 = scalar_lea.vmem %s497_s1, %s131_s12 }
  0x21   : > { %124 = vst.msk [vmem:[%s422_s17 + $0x3] sm:$0x1] %vm108_vm0, %v123_v3  ;;  %v128_v4 = vld [vmem:[%s127_s4] sm:$0x1]  ;;  %s160_s24 = sshll.u32 %s156_s10, 4  ;;  %s502_s12 = sand.u32 1, %s333_s14   ;;  %s161_s24 = int_to_ptr.hbm [resolvable:$true] %s160_s24 }
  0x22   : > { %129 = vst.msk [vmem:[%s422_s17 + $0x4] sm:$0x1] %vm108_vm0, %v128_v4  ;;  %v133_v5 = vld [vmem:[%s132_s5] sm:$0x1]  ;;  %s137_s26 = scalar_lea.vmem %s497_s1, %s136_s19  ;;  %s146_s10 = scalar_lea.sflag [#allocation5], %s502_s12 }
  0x23   : > { %134 = vst.msk [vmem:[%s422_s17 + $0x5] sm:$0x1] %vm108_vm0, %v133_v5  ;;  %v138_v6 = vld [vmem:[%s137_s26] sm:$0x1]  ;;  %s142_s9 = scalar_lea.vmem %s497_s1, %s141_s27  ;;  %s291_s0 = sshra.s32 %s161_s24, 4  ;;  %s292_s0 = int_to_ptr.hbm [resolvable:$true] %s291_s0 }
  0x24   : > { %139 = vst.msk [vmem:[%s422_s17 + $0x6] sm:$0x1] %vm108_vm0, %v138_v6  ;;  %v143_v7 = vld [vmem:[%s142_s9] sm:$0x1]  ;;  %s293_s28 = scalar_lea.hbm %s292_s0, 8  ;;  %s297_s29 = scalar_lea.hbm %s498_s2, 16 }
  0x25   : > { %144 = vst.msk [vmem:[%s422_s17 + $0x7] sm:$0x1] %vm108_vm0, %v143_v7  ;;  %p294_p10 = scmp.ne.s32.totalorder %s292_s0, %s293_s28  ;;  %p298_p13 = scmp.lt.s32.totalorder %s292_s0, %s498_s2 }
  0x26   : > { %p299_p0 = scmp.lt.s32.totalorder %s297_s29, %s293_s28 }
  0x27   : > { %p295_p11 = pnand %p294_p10, %p397_p5 }
  0x28   : > { %p300_p1 = por %p299_p0, %p298_p13 }
  0x29   : > { %p296_p12 = pneg %p295_p11 }
  0x2b   : > { %p301_p2 = pnand %p300_p1, %p296_p12 }
  0x2d   : > { %304 = shalt.err (!%p301_p2)
}
  0x2e   : > { %225 = dma.vmem_to_hbm [thread:$0]  (%p397_p5), %s159_s30, 128, %s161_s24, %s146_s10  }
  0x2f PF: > { %p231_p3 = scmp.ge.s32.totalorder %s341_s16, 2  ;;  %s172_s17 = sand.u32 1, %s329_s13  }
  0x30   : > { %s173_s25 = scalar_lea.sflag [#allocation5], %s172_s17 }
  0x31   : > { %p228_p4 = pnand %p231_p3, %p401_p6 }
  0x33   : > { %p229_p7 = pneg %p228_p4 }
  0x35   : > { %324 = dma.done.wait (%p229_p7), %s173_s25, 128  }
  0x36   : > { %326 = vsyncadd (%p229_p7), %s173_s25, 4294967168  ;;  %p20_p8 = scmp.ge.s32.totalorder %s385_s18, 4   ;;  %s503_s13 = smov %s333_s14 }
  0x37   : > { %s504_s14 = smov %s337_s15  ;;  %s505_s15 = smov %s395_s21 }
  0x38   : > { %s506_s16 = smov %s385_s18  ;;  %22 = sbr.rel (!%p20_p8) target bundleno = 9 (0x9), region = 64 }
  0x3d   :  { %179 = vsyncpa [#allocation5], 1 }
  0x3e   :  { %181 = vsyncpa [#allocation5 + $0x1], 1 }

</bundles_post_ra>
